<compile_context>
chip_gen: v7x
topology: tpu7x:2x2x1
jax: 0.10.0
libtpu: 0.0.40
codegen_flags: <defaults>
</compile_context>

<pallas_src>
import functools

import jax
import jax.numpy as jnp
from jax.experimental import pallas as pl
from jax.experimental.pallas import tpu as pltpu


def _ranker_cos_emb_loss_kernel(cos_ref, mask_ref, out_ref,
                                tgt_cnt_acc, cos_tgt_acc, hinge_acc, *,
                                margin: float, n_items: int, tile_n: int,
                                items_ragged: bool):
    """One (doc_tile, item_chunk) grid step.

    cos_ref : (TILE_D, TILE_N) native dtype (bf16/f32), upcast to f32 in-vreg
    mask_ref: (TILE_D, TILE_N) native dtype (bool / any int); nonzero == target
    out_ref : (2, TILE_D) f32  -- row 0 = per-doc target loss, row 1 = non-target
    *_acc   : (TILE_D, 1) f32 VMEM scratch accumulators (persist across j)
    """
    j = pl.program_id(1)

    @pl.when(j == 0)
    def _init():
        tgt_cnt_acc[...] = jnp.zeros_like(tgt_cnt_acc)
        cos_tgt_acc[...] = jnp.zeros_like(cos_tgt_acc)
        hinge_acc[...] = jnp.zeros_like(hinge_acc)

    cos = cos_ref[...].astype(jnp.float32)
    m_raw = mask_ref[...]
    m = m_raw if m_raw.dtype == jnp.bool_ else (m_raw != 0)

    if items_ragged:
        # Ragged last item chunk: mask out the out-of-bounds columns (their
        # contents are unspecified).  Only emitted when n_items % tile_n != 0.
        col = jax.lax.broadcasted_iota(jnp.int32, m.shape, 1) + j * tile_n
        valid = col < n_items
        m_t = jnp.logical_and(valid, m)
        m_nt = jnp.logical_and(valid, jnp.logical_not(m))
    else:
        m_t = m
        m_nt = jnp.logical_not(m)

    zero = jnp.float32(0.0)
    # Select-based masking: no float mask materialization, no mask multiplies.
    # sum((1-cos)*mask) == tgt_cnt - sum(cos where tgt); nontgt_cnt ==
    # n_items - tgt_cnt (every valid item is either target or non-target), so
    # only 3 cross-lane reductions are needed per tile.
    tgt_cnt_acc[...] += jnp.sum(jnp.where(m_t, 1.0, zero), axis=-1, keepdims=True)
    cos_tgt_acc[...] += jnp.sum(jnp.where(m_t, cos, zero), axis=-1, keepdims=True)
    hinge = jnp.maximum(cos - jnp.float32(margin), zero)
    hinge_acc[...] += jnp.sum(jnp.where(m_nt, hinge, zero), axis=-1, keepdims=True)

    @pl.when(j == pl.num_programs(1) - 1)
    def _finalize():
        tgt_cnt = tgt_cnt_acc[...]                                   # (T, 1)
        lt = (tgt_cnt - cos_tgt_acc[...]) / tgt_cnt                  # 0/0 -> NaN, matches torch.mean([])
        lnt = hinge_acc[...] / (jnp.float32(n_items) - tgt_cnt)
        # Lane-dense combined store: (T, 2) -> (2, T); the transpose runs once
        # per doc tile on the otherwise idle XLU.
        out_ref[...] = jnp.concatenate([lt, lnt], axis=1).T


def _vmem_budget():
    """(raw-input bytes per block, vmem_limit_bytes), sized per chip generation."""
    try:
        vmem = int(getattr(pltpu.get_tpu_info(), "vmem_capacity_bytes", 64 << 20))
    except Exception:
        vmem = 64 << 20
    if vmem >= (100 << 20):          # v5e / v6e: 128 MiB physical VMEM per TC
        return 6 << 20, 64 << 20
    return 4 << 20, 48 << 20          # v7x: 64 MiB VMEM per TC -> tighter cap


def _choose_tiles(n_docs, n_items, bytes_per_item, budget):
    """Pick (tile_d, tile_n).  Multi-block tiles are multiples of 128 so the
    lane-dense (2, tile_d) output block and the int8/bool mask sublane tiling
    are always legal; a single block just uses the full array dims."""
    per_row = n_items * bytes_per_item
    max_rows = int(budget // max(per_row, 1))
    if max_rows >= n_docs:
        return n_docs, n_items                       # whole problem in one block
    if max_rows >= 128:
        return (max_rows // 128) * 128, n_items      # tile docs only
    # Items too wide even for a 128-row slab: also chunk the item axis.
    tile_d = n_docs if n_docs <= 128 else 128
    max_cols = int(budget // max(tile_d * bytes_per_item, 1))
    tile_n = max(128, (max_cols // 128) * 128)
    if tile_n >= n_items:
        tile_n = n_items
    return tile_d, tile_n


def ranker_cos_emb_loss(cos_pred: jax.Array, mask_gt: jax.Array,
                        margin: float = 0.0, *,
                        tile_d: int | None = None, tile_n: int | None = None):
    """Pallas implementation of RankerCosEmbLoss.forward.

    Args:
      cos_pred: (n_docs, n_items) float array (f32 or bf16), read natively.
      mask_gt:  (n_docs, n_items) bool / int array, read natively (no cast).
      margin:   scalar margin (the module's registered buffer).
      tile_d/tile_n: optional overrides (multiples of 128 when < full extent).

    Returns:
      (loss, loss_tgt, loss_nontgt) scalar float32 arrays.
    """
    n_docs, n_items = cos_pred.shape
    assert mask_gt.shape == (n_docs, n_items)

    budget, vmem_limit = _vmem_budget()
    bytes_per_item = (jnp.dtype(cos_pred.dtype).itemsize
                      + jnp.dtype(mask_gt.dtype).itemsize)

    if tile_d is None and tile_n is None:
        td, tn = _choose_tiles(n_docs, n_items, bytes_per_item, budget)
    else:
        td = n_docs if tile_d is None else min(int(tile_d), n_docs)
        tn = n_items if tile_n is None else min(int(tile_n), n_items)
    if td < n_docs and td % 128 != 0:
        raise ValueError("tile_d must be a multiple of 128 (or cover all docs)")
    if tn < n_items and tn % 128 != 0:
        raise ValueError("tile_n must be a multiple of 128 (or cover all items)")

    grid = (pl.cdiv(n_docs, td), pl.cdiv(n_items, tn))
    items_ragged = (n_items % tn) != 0

    kernel = functools.partial(
        _ranker_cos_emb_loss_kernel, margin=float(margin), n_items=n_items,
        tile_n=tn, items_ragged=items_ragged)

    # TODO(synk): on v7x, profile whether "parallel" shards the doc-tile axis
    # across both TensorCores; if not, switch to pltpu.CORE_PARALLEL.
    per_doc = pl.pallas_call(
        kernel,
        out_shape=jax.ShapeDtypeStruct((2, n_docs), jnp.float32),
        grid=grid,
        in_specs=[
            pl.BlockSpec((td, tn), lambda i, j: (i, j)),
            pl.BlockSpec((td, tn), lambda i, j: (i, j)),
        ],
        out_specs=pl.BlockSpec((2, td), lambda i, j: (0, i)),
        scratch_shapes=[
            pltpu.VMEM((td, 1), jnp.float32),   # tgt_cnt
            pltpu.VMEM((td, 1), jnp.float32),   # sum(cos where tgt)
            pltpu.VMEM((td, 1), jnp.float32),   # sum(hinge where non-tgt)
        ],
        compiler_params=pltpu.CompilerParams(
            dimension_semantics=("parallel", "arbitrary"),
            vmem_limit_bytes=vmem_limit,
        ),
    )(cos_pred, mask_gt)

    # Tiny O(n_docs) epilogue outside the kernel (keeps the doc axis parallel).
    per_doc_mean = jnp.mean(per_doc, axis=1)           # (2,)
    loss_tgt = per_doc_mean[0]
    loss_nontgt = per_doc_mean[1]
    loss = (loss_tgt + loss_nontgt) * 0.5
    # TODO(synk): the torch module's NaN-detect / print / sys.exit(0) branch is
    # host-side control flow with no Pallas equivalent; NaNs propagate into
    # `loss` exactly as they would right before that branch fires.
    return loss, loss_tgt, loss_nontgt


def _reference(cos_pred, mask_gt, margin=0.0):
    # Plain-JAX reference mirroring the PyTorch loop, for a sanity check.
    cos = cos_pred.astype(jnp.float32)
    mf = mask_gt.astype(jnp.bool_).astype(jnp.float32)
    inv = 1.0 - mf
    tgt = jnp.sum((1.0 - cos) * mf, axis=-1) / jnp.sum(mf, axis=-1)
    nontgt = jnp.sum(jnp.maximum(cos - margin, 0.0) * inv, axis=-1) / jnp.sum(inv, axis=-1)
    loss_tgt = jnp.mean(tgt)
    loss_nontgt = jnp.mean(nontgt)
    return (loss_tgt + loss_nontgt) / 2.0, loss_tgt, loss_nontgt


if __name__ == "__main__":
    root_key = jax.random.PRNGKey(0)

    def make_inputs(key, n_docs, n_items, dtype, mask_dtype):
        k1, k2 = jax.random.split(key)
        cos = jax.random.uniform(k1, (n_docs, n_items), jnp.float32,
                                 minval=-1.0, maxval=1.0).astype(dtype)
        mask = jax.random.bernoulli(k2, p=0.25, shape=(n_docs, n_items))
        # Guarantee each doc has at least one target and one non-target
        # (otherwise torch.mean of an empty selection -> NaN; same here).
        mask = mask.at[:, 0].set(True).at[:, 1].set(False)
        return cos, mask.astype(mask_dtype)

    cases = [
        # single full-array block, f32 cos, native bool mask
        dict(n_docs=8, n_items=128, dtype=jnp.float32, mask_dtype=jnp.bool_, margin=0.0),
        # multiple doc tiles with a ragged last doc tile, int8 mask
        dict(n_docs=300, n_items=256, dtype=jnp.float32, mask_dtype=jnp.int8,
             margin=0.1, tile_d=128),
        # n_items not a multiple of 128 (padded-lane reduction), bf16 cos, bool mask
        dict(n_docs=16, n_items=200, dtype=jnp.bfloat16, mask_dtype=jnp.bool_, margin=0.05),
        # item-axis chunking with a ragged last item chunk, wide int32 mask (no cast)
        dict(n_docs=8, n_items=300, dtype=jnp.float32, mask_dtype=jnp.int32,
             margin=0.0, tile_n=128),
        # full 2-D grid: docs and items both tiled, bf16 cos, bool mask
        dict(n_docs=256, n_items=384, dtype=jnp.bfloat16, mask_dtype=jnp.bool_,
             margin=0.2, tile_d=128, tile_n=128),
    ]

    key = root_key
    for idx, c in enumerate(cases):
        key, sub = jax.random.split(key)
        cos_pred, mask_gt = make_inputs(sub, c["n_docs"], c["n_items"],
                                        c["dtype"], c["mask_dtype"])

        got = ranker_cos_emb_loss(cos_pred, mask_gt, c["margin"],
                                  tile_d=c.get("tile_d"), tile_n=c.get("tile_n"))
        got = jax.block_until_ready(got)
        want = _reference(cos_pred, mask_gt, c["margin"])

        for g, w in zip(got, want):
            assert jnp.allclose(g, w, atol=2e-5, rtol=2e-5), (idx, g, w)

    print("KERNEL_OK")
</pallas_src>

<mosaic_0001>
module attributes {stable_mosaic.version = 11 : i64} {
  func.func @_ranker_cos_emb_loss_kernel(%arg0: i32, %arg1: i32, %arg2: memref<8x128xf32, #tpu.memory_space<vmem>>, %arg3: memref<8x128xi32, #tpu.memory_space<vmem>>, %arg4: memref<2x8xf32, #tpu.memory_space<vmem>>, %arg5: memref<8x1xf32, #tpu.memory_space<vmem>>, %arg6: memref<8x1xf32, #tpu.memory_space<vmem>>, %arg7: memref<8x1xf32, #tpu.memory_space<vmem>>) attributes {dimension_semantics = [#tpu.dimension_semantics<parallel>, #tpu.dimension_semantics<arbitrary>], iteration_bounds = array<i64: 1, 1>, scalar_prefetch = 0 : i64, scratch_operands = 3 : i64, tpu.core_type = #tpu.core_type<tc>, window_params = [{transform_indices = @transform_0, window_bounds = array<i64: 8, 128>}, {transform_indices = @transform_1, window_bounds = array<i64: 8, 128>}, {transform_indices = @transform_2, window_bounds = array<i64: 2, 8>}]} {
    %c0_i32 = arith.constant 0 : i32
    %0 = arith.cmpi eq, %arg1, %c0_i32 : i32
    %1 = arith.extui %0 : i1 to i32
    %c0_i32_0 = arith.constant 0 : i32
    %2 = arith.cmpi ne, %1, %c0_i32_0 : i32
    scf.if %2 {
      %cst_28 = arith.constant 0.000000e+00 : f32
      %36 = vector.broadcast %cst_28 : f32 to vector<8x1xf32>
      %c0_29 = arith.constant 0 : index
      %c0_30 = arith.constant 0 : index
      %37 = vector.load %arg5[%c0_29, %c0_30] : memref<8x1xf32, #tpu.memory_space<vmem>>, vector<8x1xf32>
      tpu.vector_store %arg5[%c0_29, %c0_30], %36 {strides = array<i32>} : memref<8x1xf32, #tpu.memory_space<vmem>>, vector<8x1xf32>,
      %cst_31 = arith.constant 0.000000e+00 : f32
      %38 = vector.broadcast %cst_31 : f32 to vector<8x1xf32>
      %c0_32 = arith.constant 0 : index
      %c0_33 = arith.constant 0 : index
      %39 = vector.load %arg6[%c0_32, %c0_33] : memref<8x1xf32, #tpu.memory_space<vmem>>, vector<8x1xf32>
      tpu.vector_store %arg6[%c0_32, %c0_33], %38 {strides = array<i32>} : memref<8x1xf32, #tpu.memory_space<vmem>>, vector<8x1xf32>,
      %cst_34 = arith.constant 0.000000e+00 : f32
      %40 = vector.broadcast %cst_34 : f32 to vector<8x1xf32>
      %c0_35 = arith.constant 0 : index
      %c0_36 = arith.constant 0 : index
      %41 = vector.load %arg7[%c0_35, %c0_36] : memref<8x1xf32, #tpu.memory_space<vmem>>, vector<8x1xf32>
      tpu.vector_store %arg7[%c0_35, %c0_36], %40 {strides = array<i32>} : memref<8x1xf32, #tpu.memory_space<vmem>>, vector<8x1xf32>,
    } else {
    }
    %c0 = arith.constant 0 : index
    %c0_1 = arith.constant 0 : index
    %3 = vector.load %arg2[%c0, %c0_1] : memref<8x128xf32, #tpu.memory_space<vmem>>, vector<8x128xf32>
    %c0_2 = arith.constant 0 : index
    %c0_3 = arith.constant 0 : index
    %4 = vector.load %arg3[%c0_2, %c0_3] : memref<8x128xi32, #tpu.memory_space<vmem>>, vector<8x128xi32>
    %cst = arith.constant dense<0> : vector<8x128xi32>
    %5 = arith.cmpi ne, %4, %cst : vector<8x128xi32>
    %cst_4 = arith.constant dense<true> : vector<8x128xi1>
    %6 = arith.xori %5, %cst_4 : vector<8x128xi1>
    %c0_5 = arith.constant 0 : index
    %c0_6 = arith.constant 0 : index
    %7 = vector.load %arg5[%c0_5, %c0_6] : memref<8x1xf32, #tpu.memory_space<vmem>>, vector<8x1xf32>
    %cst_7 = arith.constant 1.000000e+00 : f32
    %cst_8 = arith.constant 0.000000e+00 : f32
    %8 = vector.broadcast %cst_7 : f32 to vector<8x128xf32>
    %9 = vector.broadcast %cst_8 : f32 to vector<8x128xf32>
    %10 = arith.select %5, %8, %9 : vector<8x128xi1>, vector<8x128xf32>
    %cst_9 = arith.constant dense<0.000000e+00> : vector<8xf32>
    %11 = vector.multi_reduction <add>, %10, %cst_9 [1] : vector<8x128xf32> to vector<8xf32>
    %12 = vector.shape_cast %11 : vector<8xf32> to vector<8x1xf32>
    %13 = arith.addf %7, %12 : vector<8x1xf32>
    %c0_10 = arith.constant 0 : index
    %c0_11 = arith.constant 0 : index
    %14 = vector.load %arg5[%c0_10, %c0_11] : memref<8x1xf32, #tpu.memory_space<vmem>>, vector<8x1xf32>
    tpu.vector_store %arg5[%c0_10, %c0_11], %13 {strides = array<i32>} : memref<8x1xf32, #tpu.memory_space<vmem>>, vector<8x1xf32>,
    %c0_12 = arith.constant 0 : index
    %c0_13 = arith.constant 0 : index
    %15 = vector.load %arg6[%c0_12, %c0_13] : memref<8x1xf32, #tpu.memory_space<vmem>>, vector<8x1xf32>
    %cst_14 = arith.constant 0.000000e+00 : f32
    %16 = vector.broadcast %cst_14 : f32 to vector<8x128xf32>
    %17 = arith.select %5, %3, %16 : vector<8x128xi1>, vector<8x128xf32>
    %cst_15 = arith.constant dense<0.000000e+00> : vector<8xf32>
    %18 = vector.multi_reduction <add>, %17, %cst_15 [1] : vector<8x128xf32> to vector<8xf32>
    %19 = vector.shape_cast %18 : vector<8xf32> to vector<8x1xf32>
    %20 = arith.addf %15, %19 : vector<8x1xf32>
    %c0_16 = arith.constant 0 : index
    %c0_17 = arith.constant 0 : index
    %21 = vector.load %arg6[%c0_16, %c0_17] : memref<8x1xf32, #tpu.memory_space<vmem>>, vector<8x1xf32>
    tpu.vector_store %arg6[%c0_16, %c0_17], %20 {strides = array<i32>} : memref<8x1xf32, #tpu.memory_space<vmem>>, vector<8x1xf32>,
    %cst_18 = arith.constant 0.000000e+00 : f32
    %22 = vector.broadcast %cst_18 : f32 to vector<8x128xf32>
    %23 = arith.subf %3, %22 : vector<8x128xf32>
    %cst_19 = arith.constant 0.000000e+00 : f32
    %24 = vector.broadcast %cst_19 : f32 to vector<8x128xf32>
    %25 = arith.maximumf %23, %24 : vector<8x128xf32>
    %c0_20 = arith.constant 0 : index
    %c0_21 = arith.constant 0 : index
    %26 = vector.load %arg7[%c0_20, %c0_21] : memref<8x1xf32, #tpu.memory_space<vmem>>, vector<8x1xf32>
    %cst_22 = arith.constant 0.000000e+00 : f32
    %27 = vector.broadcast %cst_22 : f32 to vector<8x128xf32>
    %28 = arith.select %6, %25, %27 : vector<8x128xi1>, vector<8x128xf32>
    %cst_23 = arith.constant dense<0.000000e+00> : vector<8xf32>
    %29 = vector.multi_reduction <add>, %28, %cst_23 [1] : vector<8x128xf32> to vector<8xf32>
    %30 = vector.shape_cast %29 : vector<8xf32> to vector<8x1xf32>
    %31 = arith.addf %26, %30 : vector<8x1xf32>
    %c0_24 = arith.constant 0 : index
    %c0_25 = arith.constant 0 : index
    %32 = vector.load %arg7[%c0_24, %c0_25] : memref<8x1xf32, #tpu.memory_space<vmem>>, vector<8x1xf32>
    tpu.vector_store %arg7[%c0_24, %c0_25], %31 {strides = array<i32>} : memref<8x1xf32, #tpu.memory_space<vmem>>, vector<8x1xf32>,
    %c0_i32_26 = arith.constant 0 : i32
    %33 = arith.cmpi eq, %arg1, %c0_i32_26 : i32
    %34 = arith.extui %33 : i1 to i32
    %c0_i32_27 = arith.constant 0 : i32
    %35 = arith.cmpi ne, %34, %c0_i32_27 : i32
    scf.if %35 {
      %c0_28 = arith.constant 0 : index
      %c0_29 = arith.constant 0 : index
      %36 = vector.load %arg5[%c0_28, %c0_29] : memref<8x1xf32, #tpu.memory_space<vmem>>, vector<8x1xf32>
      %c0_30 = arith.constant 0 : index
      %c0_31 = arith.constant 0 : index
      %37 = vector.load %arg6[%c0_30, %c0_31] : memref<8x1xf32, #tpu.memory_space<vmem>>, vector<8x1xf32>
      %38 = arith.subf %36, %37 : vector<8x1xf32>
      %39 = arith.divf %38, %36 : vector<8x1xf32>
      %c0_32 = arith.constant 0 : index
      %c0_33 = arith.constant 0 : index
      %40 = vector.load %arg7[%c0_32, %c0_33] : memref<8x1xf32, #tpu.memory_space<vmem>>, vector<8x1xf32>
      %cst_34 = arith.constant 1.280000e+02 : f32
      %41 = vector.broadcast %cst_34 : f32 to vector<8x1xf32>
      %42 = arith.subf %41, %36 : vector<8x1xf32>
      %43 = arith.divf %40, %42 : vector<8x1xf32>
      %44 = tpu.concatenate %39, %43 in 1 : vector<8x1xf32>, vector<8x1xf32> -> vector<8x2xf32>
      %45 = tpu.transpose %44, [1, 0] : vector<8x2xf32> -> vector<2x8xf32>
      %c0_35 = arith.constant 0 : index
      %c0_36 = arith.constant 0 : index
      %46 = vector.load %arg4[%c0_35, %c0_36] : memref<2x8xf32, #tpu.memory_space<vmem>>, vector<2x8xf32>
      tpu.vector_store %arg4[%c0_35, %c0_36], %45 {strides = array<i32>} : memref<2x8xf32, #tpu.memory_space<vmem>>, vector<2x8xf32>,
    } else {
    }
    return
  }
  func.func @transform_0(%arg0: i32, %arg1: i32) -> (i32, i32) {
    %c0_i32 = arith.constant 0 : i32
    return %arg0, %arg1 : i32, i32
  }
  func.func @transform_1(%arg0: i32, %arg1: i32) -> (i32, i32) {
    %c0_i32 = arith.constant 0 : i32
    return %arg0, %arg1 : i32, i32
  }
  func.func @transform_2(%arg0: i32, %arg1: i32) -> (i32, i32) {
    %c0_i32 = arith.constant 0 : i32
    %c0_i32_0 = arith.constant 0 : i32
    return %c0_i32, %arg0 : i32, i32
  }
}

</mosaic_0001>

<bundles_post_ra>
// kernel: tpu_custom_call.1
= control target key start
LH: loop header
LB: loop body
LE: loop exit
PB: predicated region body
PF: predicated region fallthrough
CT: control target
= control target key end

     0   :  { %vm16_vm0 = vcmask 7168   ;;  %v141_v3 = vmov 0.0   ;;  %s185_s0 = inlined_call_operand.vmem [shape: f32[8,128], index: 0, kind: input, shape index: {}]   ;;  %s186_s1 = inlined_call_operand.vmem [shape: s32[8,128], index: 1, kind: input, shape index: {}]   ;;  %s187_s2 = inlined_call_operand.hbm [shape: f32[2,8], index: 2, kind: output, shape index: {}]  }
   0x1   :  { %v20_v0 = vld [vmem:[%s185_s0] sm:$0xff]  ;;  %17 = vst.msk [vmem:[#allocation2] sm:$0xff] %vm16_vm0, %v141_v3  ;;  %18 = vst.msk [vmem:[#allocation3] sm:$0xff] %vm16_vm0, %v141_v3 }
   0x2   :  { %v21_v1 = vld [vmem:[%s186_s1] sm:$0xff]  ;;  %v37_v2 = vmax.f32 %v20_v0, 0.0  ;;  %19 = vst.msk [vmem:[#allocation4] sm:$0xff] %vm16_vm0, %v141_v3 }
   0x3   :  { %vm22_vm1 = vcmp.ne.s32.totalorder %v21_v1, 0 }
   0x4   :  { %7 = vsyncpa [#allocation6], 0  ;;  %v32_v4 = vsel %vm22_vm1, %v20_v0, 0.0  ;;  %v25_v5 = vsel %vm22_vm1, 1.0, %v141_v3  ;;  %vm142_vm2 = vmmov 1   ;;  %s143_s0 = smov 1  }
   0x5   :  { %vm23_vm3 = vmxor %vm22_vm1, %vm142_vm2  ;;  %33 = vadd.xlane.f32.xlu1 %v32_v4  ;;  %26 = vadd.xlane.f32.xlu0 %v25_v5  ;;  %s144_s1 = smov [#allocation5]   ;;  %vm93_vm4 = vcmask 58368  }
   0x6   :  { %v39_v6 = vsel %vm23_vm3, %v37_v2, 0.0  ;;  %s101_s13 = sshll.u32 %s144_s1, 4  ;;  %s102_s13 = int_to_ptr.vmem [resolvable:$true] %s101_s13 }
   0x7   :  { %s117_s14 = scalar_lea.vmem %s102_s13, 32  ;;  %p122_p1 = scmp.lt.s32.totalorder %s102_s13, %s102_s13 }
   0x8   :  { %v31_v7 = vld [vmem:[#allocation3] sm:$0xff]  ;;  %v24_v8 = vld [vmem:[#allocation2] sm:$0xff]  ;;  %p118_p0 = scmp.ne.s32.totalorder %s102_s13, %s117_s14  ;;  %p123_p2 = scmp.lt.s32.totalorder %s117_s14, %s117_s14 }
   0x9   :  { %40 = vadd.xlane.f32.xlu0 %v39_v6  ;;  %v38_v13 = vld [vmem:[#allocation4] sm:$0xff] }
   0xa   :  { %p124_p3 = por %p123_p2, %p122_p1 }
   0xc   :  { %p125_p4 = pnand %p124_p3, %p118_p0 }
  0x92   :  { %v34_v9 = vpop.xlane.xlu1 %33  ;;  %v27_v10 = vpop.xlane.xlu0 %26 }
  0x93   :  { %v35_v11 = vadd.f32 %v34_v9, %v31_v7  ;;  %v28_v12 = vadd.f32 %v27_v10, %v24_v8 }
  0x95   :  { %36 = vst.msk [vmem:[#allocation3] sm:$0xff] %vm16_vm0, %v35_v11  ;;  %30 = vst.msk [vmem:[#allocation2] sm:$0xff] %vm16_vm0, %v28_v12 }
  0x96   :  { %v41_v14 = vpop.xlane.xlu0 %40 }
  0x97   :  { %v42_v15 = vadd.f32 %v41_v14, %v38_v13 }
  0x99   :  { %43 = vst.msk [vmem:[#allocation4] sm:$0xff] %vm16_vm0, %v42_v15 }
  0x9c   :  { %v47_v16 = vld [vmem:[#allocation2] sm:$0xff]  ;;  %v48_v21 = vld [vmem:[#allocation3] sm:$0xff] }
  0x9d   :  { %v53_v17 = vsub.f32 128.0, %v47_v16  ;;  %v49_v23 = vsub.f32 %v47_v16, %v48_v21 }
  0x9f   :  { %113 = vrcp.f32 %v53_v17 }
  0xa0   :  { %v52_v18 = vld [vmem:[#allocation4] sm:$0xff]  ;;  %115 = vrcp.f32 %v47_v16 }
  0xa9   :  { %v114_v19 = vpop.eup %113 }
  0xaa   :  { %v55_v20 = vmul.f32 %v114_v19, %v52_v18  ;;  %v116_v22 = vpop.eup %115 }
  0xab   :  { %v51_v24 = vmul.f32 %v116_v22, %v49_v23 }
  0xac   :  { %57 = vrot.lane.b32.xlu1 %v55_v20, %s143_s0 }
 0x11e   :  { %v58_v25 = vpop.permute.xlu1 %57 }
 0x11f   :  { %v60_v26 = vsel %vm16_vm0, %v51_v24, %v58_v25 }
 0x120   :  { %61 = vxpose.xlu0.b32.start.end [1/1] (short) (narrow) %v60_v26, 8 }
 0x1a0   :  { %v77_v27 = vpop.trf.xlu0 }
 0x1a1   :  { %94 = vst.msk [vmem:[#allocation5] sm:$0x3] %vm93_vm4, %v77_v27 }
 0x1a2   :  { %128 = shalt.err (!%p125_p4)
}
 0x1a3   :  { %s129_s17 = scalar_lea.hbm %s187_s2, 32 }
 0x1a4   :  { %p130_p5 = scmp.ne.s32.totalorder %s187_s2, %s129_s17  ;;  %p133_p6 = scmp.lt.u32.totalorder %s129_s17, %s187_s2 }
 0x1a6   :  { %p135_p7 = pnand %p133_p6, %p130_p5 }
 0x1a8   :  { %138 = shalt.err (!%p135_p7)
}
 0x1a9   :  { %104 = dma.vmem_to_hbm [thread:$0]  %s102_s13, 32, %s187_s2, [#allocation6]  }
 0x1aa   :  { %139 = dma.done.wait [#allocation6], 32  }
 0x1ab   :  { %140 = vsyncadd [#allocation6], 4294967264 }
 0x1ac   :  { %108 = vsyncpa [#allocation6], 1 }

</bundles_post_ra>
